<compile_context>
chip_gen: v7x
topology: tpu7x:2x2x1
jax: 0.10.0
libtpu: 0.0.40
codegen_flags: <defaults>
</compile_context>

<pallas_src>
import functools

import numpy as np
import jax
import jax.numpy as jnp
from jax.experimental import pallas as pl
from jax.experimental.pallas import tpu as pltpu

TEMPLATE_SIZE = 127
SEARCH_SIZE = 255
_SHIFT = float((SEARCH_SIZE - TEMPLATE_SIZE) // 2)   # 64.0


def _ipow(x, p):
    """x**p via explicit multiplies when p is a small positive integer (VPU not EUP)."""
    ip = int(p)
    if float(ip) != float(p) or ip < 1 or ip > 16:
        return jnp.power(x, p)          # fallback for non-integer exponents
    result = None
    base = x
    n = ip
    while n:
        if n & 1:
            result = base if result is None else result * base
        n >>= 1
        if n:
            base = base * base
    return result


def _heatmap_loss_kernel(*refs, level_shapes, sigma, alpha, beta,
                         cls_weight, reg_weight, inv_nl):
    """refs = [cls_scal_0, reg_scal_0, cls_0, reg_0, cls_scal_1, ..., out_ref]."""
    out_ref = refs[-1]
    neg_half_inv_sig2 = -0.5 / (sigma * sigma)

    loss_cls = 0.0
    loss_reg = 0.0
    for l, (H, W) in enumerate(level_shapes):
        cls_scal = refs[4 * l + 0]   # (N, 2)   [px, py]            (f32)
        reg_scal = refs[4 * l + 1]   # (4N, 5)  [A, BR, BC, px, py] (f32)
        cls_ref = refs[4 * l + 2]    # (N, H*W)   predictions (any float dtype)
        reg_ref = refs[4 * l + 3]    # (4N, H*W)  predictions (any float dtype)
        L = H * W

        # row/col index of every flattened position, pure VPU.  Exact because the
        # true remainder keeps a 0.5/W margin to the nearest integer.
        ii = jax.lax.broadcasted_iota(jnp.int32, (1, L), 1).astype(jnp.float32)
        row = jnp.floor((ii + 0.5) * (1.0 / W))     # H-axis index (bbox-x axis)
        col = ii - row * W                           # W-axis index (bbox-y axis)

        # ---- focal classification loss --------------------------------------
        px = cls_scal[:, 0:1]                        # (N, 1)
        py = cls_scal[:, 1:2]
        dx = row - px                                # (N, L)
        dy = col - py
        is_peak = (dx == 0.0) & (dy == 0.0)
        cls_gt = jnp.exp(neg_half_inv_sig2 * (dx * dx + dy * dy))

        cls = jnp.clip(cls_ref[...].astype(jnp.float32), 1e-6, 1.0 - 1e-6)
        pos = _ipow(1.0 - cls, alpha) * _ipow(cls_gt, beta) * jnp.log(cls)
        neg = _ipow(cls, alpha) * _ipow(1.0 - cls_gt, beta) * jnp.log(1.0 - cls)
        # per-(level,sample) mean folded into one weighted sum: -sum / (H*W)
        loss_cls = loss_cls + jnp.sum(jnp.where(is_peak, pos, neg)) * (-1.0 / L)

        # ---- peak-masked L1 regression loss ----------------------------------
        # reg target per row r = 4*i + c:  gt = A + BR*row + BC*col, with
        #   c=0: A=cx/s, BR=-1, BC=0     c=1: A=cy/s, BR=0, BC=-1
        #   c=2: A=w/s,  BR=BC=0         c=3: A=h/s,  BR=BC=0
        a = reg_scal[:, 0:1]                         # (4N, 1)
        br = reg_scal[:, 1:2]
        bc = reg_scal[:, 2:3]
        pxr = reg_scal[:, 3:4]
        pyr = reg_scal[:, 4:5]
        reg_gt = a + br * row + bc * col             # (4N, L)
        l1 = jnp.abs(reg_ref[...].astype(jnp.float32) - reg_gt)
        peak_r = (row == pxr) & (col == pyr)
        loss_reg = loss_reg + 0.25 * jnp.sum(jnp.where(peak_r, l1, 0.0))

    loss_cls = loss_cls * inv_nl
    loss_reg = loss_reg * inv_nl
    out_ref[0] = cls_weight * loss_cls + reg_weight * loss_reg
    out_ref[1] = loss_cls
    out_ref[2] = loss_reg


@functools.partial(jax.jit,
                   static_argnames=("cls_weight", "reg_weight", "stride",
                                    "sigma", "alpha", "beta"))
def heatmap_loss(pred_cls, pred_reg, gt_bbox, *, cls_weight=1.0, reg_weight=1.0,
                 stride=(4, 8), sigma=1.0, alpha=2.0, beta=4.0):
    """Returns (loss_total, loss_cls, loss_reg) scalars, matching the torch module."""
    num_levels = min(len(pred_cls), len(pred_reg), len(stride))
    N = int(gt_bbox.shape[0])

    # Per-sample bbox scalars (tiny XLA ops, fused under jit).
    g = gt_bbox.astype(jnp.float32) - _SHIFT
    x1, y1, x2, y2 = g[:, 0], g[:, 1], g[:, 2], g[:, 3]
    cx = 0.5 * (x1 + x2)
    cy = 0.5 * (y1 + y2)
    w = x2 - x1
    h = y2 - y1

    br_pat = jnp.tile(jnp.array([-1.0, 0.0, 0.0, 0.0], jnp.float32), N)   # (4N,)
    bc_pat = jnp.tile(jnp.array([0.0, -1.0, 0.0, 0.0], jnp.float32), N)   # (4N,)

    inputs = []
    level_shapes = []
    for l in range(num_levels):
        cls_l, reg_l, s = pred_cls[l], pred_reg[l], float(stride[l])
        H, W = int(cls_l.shape[-2]), int(cls_l.shape[-1])
        level_shapes.append((H, W))

        px = jnp.floor(cx / s)                       # == cx // s (true division)
        py = jnp.floor(cy / s)
        cls_scal = jnp.stack([px, py], axis=1)                             # (N, 2)
        a = jnp.stack([cx / s, cy / s, w / s, h / s], axis=1).reshape(-1)  # (4N,)
        reg_scal = jnp.stack([a, br_pat, bc_pat,
                              jnp.repeat(px, 4), jnp.repeat(py, 4)],
                             axis=1)                                       # (4N, 5)

        inputs += [cls_scal, reg_scal,
                   cls_l.reshape(N, H * W),       # free reshape, dtype untouched
                   reg_l.reshape(N * 4, H * W)]   # free reshape, dtype untouched

    kernel = functools.partial(
        _heatmap_loss_kernel, level_shapes=tuple(level_shapes),
        sigma=float(sigma), alpha=float(alpha), beta=float(beta),
        cls_weight=float(cls_weight), reg_weight=float(reg_weight),
        inv_nl=1.0 / float(N * num_levels))

    out = pl.pallas_call(
        kernel,
        out_shape=jax.ShapeDtypeStruct((3,), jnp.float32),
        in_specs=[pl.BlockSpec(memory_space=pltpu.MemorySpace.VMEM)] * len(inputs),
        out_specs=pl.BlockSpec(memory_space=pltpu.MemorySpace.SMEM),
    )(*inputs)

    return out[0], out[1], out[2]


def _ref_numpy(pred_cls, pred_reg, gt_bbox, cls_weight=1.0, reg_weight=1.0,
               stride=(4, 8), sigma=1.0, alpha=2.0, beta=4.0):
    """float64 numpy port of the torch reference (per level, per sample)."""
    shift = (SEARCH_SIZE - TEMPLATE_SIZE) // 2
    lcs, lrs = [], []
    for cls_pd, reg_pd, s in zip(pred_cls, pred_reg, stride):
        cls_pd = np.asarray(cls_pd, np.float64)
        reg_pd = np.asarray(reg_pd, np.float64)
        N, _, H, W = cls_pd.shape
        for i in range(N):
            x1, y1, x2, y2 = np.asarray(gt_bbox[i], np.float64) - shift
            cx, cy = 0.5 * (x1 + x2), 0.5 * (y1 + y2)
            w, h = x2 - x1, y2 - y1
            px, py = cx // s, cy // s
            X, Y = np.meshgrid(np.arange(H), np.arange(W), indexing="ij")
            cls_gt = np.exp(-0.5 * ((X - px) ** 2 + (Y - py) ** 2) / sigma ** 2)
            c = np.clip(cls_pd[i, 0], 1e-6, 1.0 - 1e-6)
            lc = -np.where(cls_gt == 1,
                           (1 - c) ** alpha * cls_gt ** beta * np.log(c),
                           c ** alpha * (1 - cls_gt) ** beta * np.log(1 - c))
            lcs.append(lc.mean())
            reg_gt = np.stack([cx / s - X, cy / s - Y,
                               np.full((H, W), w / s), np.full((H, W), h / s)])
            lr = np.abs(reg_pd[i] - reg_gt).mean(axis=0)
            lrs.append(np.where(cls_gt == 1, lr, 0.0).sum())
    lc, lr = float(np.mean(lcs)), float(np.mean(lrs))
    return cls_weight * lc + reg_weight * lr, lc, lr


if __name__ == "__main__":
    key = jax.random.PRNGKey(0)
    k1, k2, k3, k4 = jax.random.split(key, 4)

    N = 2
    sizes = (16, 8)          # feature-map sizes for strides (4, 8)
    pred_cls = [
        jax.random.uniform(k1, (N, 1, sizes[0], sizes[0]), jnp.float32, 0.05, 0.95),
        jax.random.uniform(k2, (N, 1, sizes[1], sizes[1]), jnp.float32, 0.05, 0.95),
    ]
    pred_reg = [
        jax.random.normal(k3, (N, 4, sizes[0], sizes[0]), jnp.float32),
        jax.random.normal(k4, (N, 4, sizes[1], sizes[1]), jnp.float32),
    ]
    # deterministic gt boxes (x1, y1, x2, y2) in search-image coords; peaks land
    # inside both feature maps.
    gt_bbox = jnp.array([[90.0, 100.0, 130.0, 150.0],
                         [80.0, 85.0, 140.0, 135.0]], dtype=jnp.float32)

    loss_total, loss_cls, loss_reg = heatmap_loss(pred_cls, pred_reg, gt_bbox)
    jax.block_until_ready((loss_total, loss_cls, loss_reg))

    ref_total, ref_cls, ref_reg = _ref_numpy(
        [np.asarray(c) for c in pred_cls],
        [np.asarray(r) for r in pred_reg],
        np.asarray(gt_bbox))
    np.testing.assert_allclose(float(loss_cls), ref_cls, rtol=1e-3, atol=1e-3)
    np.testing.assert_allclose(float(loss_reg), ref_reg, rtol=1e-3, atol=1e-3)
    np.testing.assert_allclose(float(loss_total), ref_total, rtol=1e-3, atol=1e-3)

    print("KERNEL_OK")
</pallas_src>

<mosaic_0001>
module attributes {stable_mosaic.version = 11 : i64} {
  func.func @_heatmap_loss_kernel(%arg0: memref<2x2xf32, #tpu.memory_space<vmem>>, %arg1: memref<8x5xf32, #tpu.memory_space<vmem>>, %arg2: memref<2x256xf32, #tpu.memory_space<vmem>>, %arg3: memref<8x256xf32, #tpu.memory_space<vmem>>, %arg4: memref<2x2xf32, #tpu.memory_space<vmem>>, %arg5: memref<8x5xf32, #tpu.memory_space<vmem>>, %arg6: memref<2x64xf32, #tpu.memory_space<vmem>>, %arg7: memref<8x64xf32, #tpu.memory_space<vmem>>, %arg8: memref<3xf32, #tpu.memory_space<smem>>) attributes {dimension_semantics = [], scalar_prefetch = 0 : i64, scratch_operands = 0 : i64, tpu.core_type = #tpu.core_type<tc>} {
    %0 = tpu.iota {dimensions = array<i32: 1>} : vector<1x256xi32>
    %1 = arith.sitofp %0 : vector<1x256xi32> to vector<1x256xf32>
    %cst = arith.constant 5.000000e-01 : f32
    %2 = vector.broadcast %cst : f32 to vector<1x256xf32>
    %3 = arith.addf %1, %2 : vector<1x256xf32>
    %cst_0 = arith.constant 6.250000e-02 : f32
    %4 = vector.broadcast %cst_0 : f32 to vector<1x256xf32>
    %5 = arith.mulf %3, %4 : vector<1x256xf32>
    %6 = math.floor %5 : vector<1x256xf32>
    %cst_1 = arith.constant 1.600000e+01 : f32
    %7 = vector.broadcast %cst_1 : f32 to vector<1x256xf32>
    %8 = arith.mulf %6, %7 : vector<1x256xf32>
    %9 = arith.subf %1, %8 : vector<1x256xf32>
    %c0 = arith.constant 0 : index
    %c0_2 = arith.constant 0 : index
    %10 = vector.load %arg0[%c0, %c0_2] : memref<2x2xf32, #tpu.memory_space<vmem>>, vector<2x1xf32>
    %c0_3 = arith.constant 0 : index
    %c1 = arith.constant 1 : index
    %11 = vector.load %arg0[%c0_3, %c1] : memref<2x2xf32, #tpu.memory_space<vmem>>, vector<2x1xf32>
    %12 = vector.broadcast %6 : vector<1x256xf32> to vector<2x256xf32>
    %13 = vector.broadcast %10 : vector<2x1xf32> to vector<2x256xf32>
    %14 = arith.subf %12, %13 : vector<2x256xf32>
    %15 = vector.broadcast %9 : vector<1x256xf32> to vector<2x256xf32>
    %16 = vector.broadcast %11 : vector<2x1xf32> to vector<2x256xf32>
    %17 = arith.subf %15, %16 : vector<2x256xf32>
    %cst_4 = arith.constant 0.000000e+00 : f32
    %18 = vector.broadcast %cst_4 : f32 to vector<2x256xf32>
    %19 = arith.cmpf oeq, %14, %18 : vector<2x256xf32>
    %cst_5 = arith.constant 0.000000e+00 : f32
    %20 = vector.broadcast %cst_5 : f32 to vector<2x256xf32>
    %21 = arith.cmpf oeq, %17, %20 : vector<2x256xf32>
    %22 = arith.andi %19, %21 : vector<2x256xi1>
    %23 = arith.mulf %14, %14 : vector<2x256xf32>
    %24 = arith.mulf %17, %17 : vector<2x256xf32>
    %25 = arith.addf %23, %24 : vector<2x256xf32>
    %cst_6 = arith.constant -5.000000e-01 : f32
    %26 = vector.broadcast %cst_6 : f32 to vector<2x256xf32>
    %27 = arith.mulf %26, %25 : vector<2x256xf32>
    %28 = math.exp %27 : vector<2x256xf32>
    %c0_7 = arith.constant 0 : index
    %c0_8 = arith.constant 0 : index
    %29 = vector.load %arg2[%c0_7, %c0_8] : memref<2x256xf32, #tpu.memory_space<vmem>>, vector<2x256xf32>
    %cst_9 = arith.constant 9.99999997E-7 : f32
    %cst_10 = arith.constant 0.999998986 : f32
    %30 = vector.broadcast %cst_9 : f32 to vector<2x256xf32>
    %31 = arith.maximumf %30, %29 : vector<2x256xf32>
    %32 = vector.broadcast %cst_10 : f32 to vector<2x256xf32>
    %33 = arith.minimumf %32, %31 : vector<2x256xf32>
    %cst_11 = arith.constant 1.000000e+00 : f32
    %34 = vector.broadcast %cst_11 : f32 to vector<2x256xf32>
    %35 = arith.subf %34, %33 : vector<2x256xf32>
    %36 = arith.mulf %35, %35 : vector<2x256xf32>
    %37 = arith.mulf %28, %28 : vector<2x256xf32>
    %38 = arith.mulf %37, %37 : vector<2x256xf32>
    %39 = arith.mulf %36, %38 : vector<2x256xf32>
    %40 = math.log %33 : vector<2x256xf32>
    %41 = arith.mulf %39, %40 : vector<2x256xf32>
    %42 = arith.mulf %33, %33 : vector<2x256xf32>
    %cst_12 = arith.constant 1.000000e+00 : f32
    %43 = vector.broadcast %cst_12 : f32 to vector<2x256xf32>
    %44 = arith.subf %43, %28 : vector<2x256xf32>
    %45 = arith.mulf %44, %44 : vector<2x256xf32>
    %46 = arith.mulf %45, %45 : vector<2x256xf32>
    %47 = arith.mulf %42, %46 : vector<2x256xf32>
    %cst_13 = arith.constant 1.000000e+00 : f32
    %48 = vector.broadcast %cst_13 : f32 to vector<2x256xf32>
    %49 = arith.subf %48, %33 : vector<2x256xf32>
    %50 = math.log %49 : vector<2x256xf32>
    %51 = arith.mulf %47, %50 : vector<2x256xf32>
    %52 = arith.select %22, %41, %51 : vector<2x256xi1>, vector<2x256xf32>
    %53 = vector.shape_cast %52 : vector<2x256xf32> to vector<1x2x256xf32>
    %cst_14 = arith.constant dense<0.000000e+00> : vector<1xf32>
    %54 = vector.multi_reduction <add>, %53, %cst_14 [1, 2] : vector<1x2x256xf32> to vector<1xf32>
    %55 = vector.shape_cast %54 : vector<1xf32> to vector<1x1x1xf32>
    %56 = vector.extract %55[0, 0, 0] : f32 from vector<1x1x1xf32>
    %cst_15 = arith.constant -3.906250e-03 : f32
    %57 = arith.mulf %56, %cst_15 : f32
    %cst_16 = arith.constant 0.000000e+00 : f32
    %58 = arith.addf %cst_16, %57 : f32
    %c0_17 = arith.constant 0 : index
    %c0_18 = arith.constant 0 : index
    %59 = vector.load %arg1[%c0_17, %c0_18] : memref<8x5xf32, #tpu.memory_space<vmem>>, vector<8x1xf32>
    %c0_19 = arith.constant 0 : index
    %c1_20 = arith.constant 1 : index
    %60 = vector.load %arg1[%c0_19, %c1_20] : memref<8x5xf32, #tpu.memory_space<vmem>>, vector<8x1xf32>
    %c0_21 = arith.constant 0 : index
    %c2 = arith.constant 2 : index
    %61 = vector.load %arg1[%c0_21, %c2] : memref<8x5xf32, #tpu.memory_space<vmem>>, vector<8x1xf32>
    %c0_22 = arith.constant 0 : index
    %c3 = arith.constant 3 : index
    %62 = vector.load %arg1[%c0_22, %c3] : memref<8x5xf32, #tpu.memory_space<vmem>>, vector<8x1xf32>
    %c0_23 = arith.constant 0 : index
    %c4 = arith.constant 4 : index
    %63 = vector.load %arg1[%c0_23, %c4] : memref<8x5xf32, #tpu.memory_space<vmem>>, vector<8x1xf32>
    %64 = vector.broadcast %60 : vector<8x1xf32> to vector<8x256xf32>
    %65 = vector.broadcast %6 : vector<1x256xf32> to vector<8x256xf32>
    %66 = arith.mulf %64, %65 : vector<8x256xf32>
    %67 = vector.broadcast %59 : vector<8x1xf32> to vector<8x256xf32>
    %68 = arith.addf %67, %66 : vector<8x256xf32>
    %69 = vector.broadcast %61 : vector<8x1xf32> to vector<8x256xf32>
    %70 = vector.broadcast %9 : vector<1x256xf32> to vector<8x256xf32>
    %71 = arith.mulf %69, %70 : vector<8x256xf32>
    %72 = arith.addf %68, %71 : vector<8x256xf32>
    %c0_24 = arith.constant 0 : index
    %c0_25 = arith.constant 0 : index
    %73 = vector.load %arg3[%c0_24, %c0_25] : memref<8x256xf32, #tpu.memory_space<vmem>>, vector<8x256xf32>
    %74 = arith.subf %73, %72 : vector<8x256xf32>
    %75 = math.absf %74 : vector<8x256xf32>
    %76 = vector.broadcast %6 : vector<1x256xf32> to vector<8x256xf32>
    %77 = vector.broadcast %62 : vector<8x1xf32> to vector<8x256xf32>
    %78 = arith.cmpf oeq, %76, %77 : vector<8x256xf32>
    %79 = vector.broadcast %9 : vector<1x256xf32> to vector<8x256xf32>
    %80 = vector.broadcast %63 : vector<8x1xf32> to vector<8x256xf32>
    %81 = arith.cmpf oeq, %79, %80 : vector<8x256xf32>
    %82 = arith.andi %78, %81 : vector<8x256xi1>
    %cst_26 = arith.constant 0.000000e+00 : f32
    %83 = vector.broadcast %cst_26 : f32 to vector<8x256xf32>
    %84 = arith.select %82, %75, %83 : vector<8x256xi1>, vector<8x256xf32>
    %85 = vector.shape_cast %84 : vector<8x256xf32> to vector<1x8x256xf32>
    %cst_27 = arith.constant dense<0.000000e+00> : vector<1xf32>
    %86 = vector.multi_reduction <add>, %85, %cst_27 [1, 2] : vector<1x8x256xf32> to vector<1xf32>
    %87 = vector.shape_cast %86 : vector<1xf32> to vector<1x1x1xf32>
    %88 = vector.extract %87[0, 0, 0] : f32 from vector<1x1x1xf32>
    %cst_28 = arith.constant 2.500000e-01 : f32
    %89 = arith.mulf %cst_28, %88 : f32
    %cst_29 = arith.constant 0.000000e+00 : f32
    %90 = arith.addf %cst_29, %89 : f32
    %91 = tpu.iota {dimensions = array<i32: 1>} : vector<1x64xi32>
    %92 = arith.sitofp %91 : vector<1x64xi32> to vector<1x64xf32>
    %cst_30 = arith.constant 5.000000e-01 : f32
    %93 = vector.broadcast %cst_30 : f32 to vector<1x64xf32>
    %94 = arith.addf %92, %93 : vector<1x64xf32>
    %cst_31 = arith.constant 1.250000e-01 : f32
    %95 = vector.broadcast %cst_31 : f32 to vector<1x64xf32>
    %96 = arith.mulf %94, %95 : vector<1x64xf32>
    %97 = math.floor %96 : vector<1x64xf32>
    %cst_32 = arith.constant 8.000000e+00 : f32
    %98 = vector.broadcast %cst_32 : f32 to vector<1x64xf32>
    %99 = arith.mulf %97, %98 : vector<1x64xf32>
    %100 = arith.subf %92, %99 : vector<1x64xf32>
    %c0_33 = arith.constant 0 : index
    %c0_34 = arith.constant 0 : index
    %101 = vector.load %arg4[%c0_33, %c0_34] : memref<2x2xf32, #tpu.memory_space<vmem>>, vector<2x1xf32>
    %c0_35 = arith.constant 0 : index
    %c1_36 = arith.constant 1 : index
    %102 = vector.load %arg4[%c0_35, %c1_36] : memref<2x2xf32, #tpu.memory_space<vmem>>, vector<2x1xf32>
    %103 = vector.broadcast %97 : vector<1x64xf32> to vector<2x64xf32>
    %104 = vector.broadcast %101 : vector<2x1xf32> to vector<2x64xf32>
    %105 = arith.subf %103, %104 : vector<2x64xf32>
    %106 = vector.broadcast %100 : vector<1x64xf32> to vector<2x64xf32>
    %107 = vector.broadcast %102 : vector<2x1xf32> to vector<2x64xf32>
    %108 = arith.subf %106, %107 : vector<2x64xf32>
    %cst_37 = arith.constant 0.000000e+00 : f32
    %109 = vector.broadcast %cst_37 : f32 to vector<2x64xf32>
    %110 = arith.cmpf oeq, %105, %109 : vector<2x64xf32>
    %cst_38 = arith.constant 0.000000e+00 : f32
    %111 = vector.broadcast %cst_38 : f32 to vector<2x64xf32>
    %112 = arith.cmpf oeq, %108, %111 : vector<2x64xf32>
    %113 = arith.andi %110, %112 : vector<2x64xi1>
    %114 = arith.mulf %105, %105 : vector<2x64xf32>
    %115 = arith.mulf %108, %108 : vector<2x64xf32>
    %116 = arith.addf %114, %115 : vector<2x64xf32>
    %cst_39 = arith.constant -5.000000e-01 : f32
    %117 = vector.broadcast %cst_39 : f32 to vector<2x64xf32>
    %118 = arith.mulf %117, %116 : vector<2x64xf32>
    %119 = math.exp %118 : vector<2x64xf32>
    %c0_40 = arith.constant 0 : index
    %c0_41 = arith.constant 0 : index
    %120 = vector.load %arg6[%c0_40, %c0_41] : memref<2x64xf32, #tpu.memory_space<vmem>>, vector<2x64xf32>
    %cst_42 = arith.constant 9.99999997E-7 : f32
    %cst_43 = arith.constant 0.999998986 : f32
    %121 = vector.broadcast %cst_42 : f32 to vector<2x64xf32>
    %122 = arith.maximumf %121, %120 : vector<2x64xf32>
    %123 = vector.broadcast %cst_43 : f32 to vector<2x64xf32>
    %124 = arith.minimumf %123, %122 : vector<2x64xf32>
    %cst_44 = arith.constant 1.000000e+00 : f32
    %125 = vector.broadcast %cst_44 : f32 to vector<2x64xf32>
    %126 = arith.subf %125, %124 : vector<2x64xf32>
    %127 = arith.mulf %126, %126 : vector<2x64xf32>
    %128 = arith.mulf %119, %119 : vector<2x64xf32>
    %129 = arith.mulf %128, %128 : vector<2x64xf32>
    %130 = arith.mulf %127, %129 : vector<2x64xf32>
    %131 = math.log %124 : vector<2x64xf32>
    %132 = arith.mulf %130, %131 : vector<2x64xf32>
    %133 = arith.mulf %124, %124 : vector<2x64xf32>
    %cst_45 = arith.constant 1.000000e+00 : f32
    %134 = vector.broadcast %cst_45 : f32 to vector<2x64xf32>
    %135 = arith.subf %134, %119 : vector<2x64xf32>
    %136 = arith.mulf %135, %135 : vector<2x64xf32>
    %137 = arith.mulf %136, %136 : vector<2x64xf32>
    %138 = arith.mulf %133, %137 : vector<2x64xf32>
    %cst_46 = arith.constant 1.000000e+00 : f32
    %139 = vector.broadcast %cst_46 : f32 to vector<2x64xf32>
    %140 = arith.subf %139, %124 : vector<2x64xf32>
    %141 = math.log %140 : vector<2x64xf32>
    %142 = arith.mulf %138, %141 : vector<2x64xf32>
    %143 = arith.select %113, %132, %142 : vector<2x64xi1>, vector<2x64xf32>
    %144 = vector.shape_cast %143 : vector<2x64xf32> to vector<1x2x64xf32>
    %cst_47 = arith.constant dense<0.000000e+00> : vector<1xf32>
    %145 = vector.multi_reduction <add>, %144, %cst_47 [1, 2] : vector<1x2x64xf32> to vector<1xf32>
    %146 = vector.shape_cast %145 : vector<1xf32> to vector<1x1x1xf32>
    %147 = vector.extract %146[0, 0, 0] : f32 from vector<1x1x1xf32>
    %cst_48 = arith.constant -1.562500e-02 : f32
    %148 = arith.mulf %147, %cst_48 : f32
    %149 = arith.addf %58, %148 : f32
    %c0_49 = arith.constant 0 : index
    %c0_50 = arith.constant 0 : index
    %150 = vector.load %arg5[%c0_49, %c0_50] : memref<8x5xf32, #tpu.memory_space<vmem>>, vector<8x1xf32>
    %c0_51 = arith.constant 0 : index
    %c1_52 = arith.constant 1 : index
    %151 = vector.load %arg5[%c0_51, %c1_52] : memref<8x5xf32, #tpu.memory_space<vmem>>, vector<8x1xf32>
    %c0_53 = arith.constant 0 : index
    %c2_54 = arith.constant 2 : index
    %152 = vector.load %arg5[%c0_53, %c2_54] : memref<8x5xf32, #tpu.memory_space<vmem>>, vector<8x1xf32>
    %c0_55 = arith.constant 0 : index
    %c3_56 = arith.constant 3 : index
    %153 = vector.load %arg5[%c0_55, %c3_56] : memref<8x5xf32, #tpu.memory_space<vmem>>, vector<8x1xf32>
    %c0_57 = arith.constant 0 : index
    %c4_58 = arith.constant 4 : index
    %154 = vector.load %arg5[%c0_57, %c4_58] : memref<8x5xf32, #tpu.memory_space<vmem>>, vector<8x1xf32>
    %155 = vector.broadcast %151 : vector<8x1xf32> to vector<8x64xf32>
    %156 = vector.broadcast %97 : vector<1x64xf32> to vector<8x64xf32>
    %157 = arith.mulf %155, %156 : vector<8x64xf32>
    %158 = vector.broadcast %150 : vector<8x1xf32> to vector<8x64xf32>
    %159 = arith.addf %158, %157 : vector<8x64xf32>
    %160 = vector.broadcast %152 : vector<8x1xf32> to vector<8x64xf32>
    %161 = vector.broadcast %100 : vector<1x64xf32> to vector<8x64xf32>
    %162 = arith.mulf %160, %161 : vector<8x64xf32>
    %163 = arith.addf %159, %162 : vector<8x64xf32>
    %c0_59 = arith.constant 0 : index
    %c0_60 = arith.constant 0 : index
    %164 = vector.load %arg7[%c0_59, %c0_60] : memref<8x64xf32, #tpu.memory_space<vmem>>, vector<8x64xf32>
    %165 = arith.subf %164, %163 : vector<8x64xf32>
    %166 = math.absf %165 : vector<8x64xf32>
    %167 = vector.broadcast %97 : vector<1x64xf32> to vector<8x64xf32>
    %168 = vector.broadcast %153 : vector<8x1xf32> to vector<8x64xf32>
    %169 = arith.cmpf oeq, %167, %168 : vector<8x64xf32>
    %170 = vector.broadcast %100 : vector<1x64xf32> to vector<8x64xf32>
    %171 = vector.broadcast %154 : vector<8x1xf32> to vector<8x64xf32>
    %172 = arith.cmpf oeq, %170, %171 : vector<8x64xf32>
    %173 = arith.andi %169, %172 : vector<8x64xi1>
    %cst_61 = arith.constant 0.000000e+00 : f32
    %174 = vector.broadcast %cst_61 : f32 to vector<8x64xf32>
    %175 = arith.select %173, %166, %174 : vector<8x64xi1>, vector<8x64xf32>
    %176 = vector.shape_cast %175 : vector<8x64xf32> to vector<1x8x64xf32>
    %cst_62 = arith.constant dense<0.000000e+00> : vector<1xf32>
    %177 = vector.multi_reduction <add>, %176, %cst_62 [1, 2] : vector<1x8x64xf32> to vector<1xf32>
    %178 = vector.shape_cast %177 : vector<1xf32> to vector<1x1x1xf32>
    %179 = vector.extract %178[0, 0, 0] : f32 from vector<1x1x1xf32>
    %cst_63 = arith.constant 2.500000e-01 : f32
    %180 = arith.mulf %cst_63, %179 : f32
    %181 = arith.addf %90, %180 : f32
    %cst_64 = arith.constant 2.500000e-01 : f32
    %182 = arith.mulf %149, %cst_64 : f32
    %cst_65 = arith.constant 2.500000e-01 : f32
    %183 = arith.mulf %181, %cst_65 : f32
    %cst_66 = arith.constant 1.000000e+00 : f32
    %184 = arith.mulf %cst_66, %182 : f32
    %cst_67 = arith.constant 1.000000e+00 : f32
    %185 = arith.mulf %cst_67, %183 : f32
    %186 = arith.addf %184, %185 : f32
    %c0_68 = arith.constant 0 : index
    %187 = memref.load %arg8[%c0_68] : memref<3xf32, #tpu.memory_space<smem>>
    memref.store %186, %arg8[%c0_68] : memref<3xf32, #tpu.memory_space<smem>>
    %c1_69 = arith.constant 1 : index
    %188 = memref.load %arg8[%c1_69] : memref<3xf32, #tpu.memory_space<smem>>
    memref.store %182, %arg8[%c1_69] : memref<3xf32, #tpu.memory_space<smem>>
    %c2_70 = arith.constant 2 : index
    %189 = memref.load %arg8[%c2_70] : memref<3xf32, #tpu.memory_space<smem>>
    memref.store %183, %arg8[%c2_70] : memref<3xf32, #tpu.memory_space<smem>>
    return
  }
}

</mosaic_0001>

<bundles_post_ra>
// kernel: tile.12
= control target key start
LH: loop header
LB: loop body
LE: loop exit
PB: predicated region body
PF: predicated region fallthrough
CT: control target
= control target key end

     0   :  { %s22_s0 = inlined_call_operand.vmem [shape: f32[4], index: 0, kind: input, shape index: {}]   ;;  %s23_s1 = inlined_call_operand.vmem [shape: f32[2,4], index: 1, kind: output, shape index: {}]  }
   0x1   :  { %v4_v0 = vld [vmem:[%s22_s0] ss:$0 sm:$0xff] }
   0x2   :  { %5 = vst [vmem:[%s23_s1] sm:$0x3] %v4_v0 }

// kernel: heatmap_loss.1
= control target key start
LH: loop header
LB: loop body
LE: loop exit
PB: predicated region body
PF: predicated region fallthrough
CT: control target
= control target key end

     0   :  { %v400_v2 = vmov 0   ;;  %s573_s0 = inlined_call_operand.vmem [shape: f32[2,2], index: 0, kind: input, shape index: {}]   ;;  %s574_s1 = inlined_call_operand.vmem [shape: f32[8,5], index: 1, kind: input, shape index: {}]   ;;  %s575_s2 = inlined_call_operand.vmem [shape: f32[2,256], index: 2, kind: input, shape index: {}]   ;;  %s576_s3 = inlined_call_operand.vmem [shape: f32[8,256], index: 3, kind: input, shape index: {}]   ;;  %s577_s4 = inlined_call_operand.vmem [shape: f32[2,2], index: 4, kind: input, shape index: {}]   ;;  %s578_s5 = inlined_call_operand.vmem [shape: f32[8,5], index: 5, kind: input, shape index: {}]   ;;  %s579_s6 = inlined_call_operand.vmem [shape: f32[2,64], index: 6, kind: input, shape index: {}]   ;;  %s580_s7 = inlined_call_operand.vmem [shape: f32[8,64], index: 7, kind: input, shape index: {}]   ;;  %s581_s8 = inlined_call_operand.vmem [shape: f32[3], index: 8, kind: output, shape index: {}]  }
   0x1   :  { %v222_v0 = vld [vmem:[%s577_s4] sm:$0x3]  ;;  %363 = vset.pattern.permute.xlu1 %v400_v2  ;;  %361 = vset.pattern.permute.xlu0 %v400_v2 }
   0x2   :  { %v45_v1 = vld [vmem:[%s573_s0] sm:$0x3]  ;;  %225 = vperm.xlu1 %363, %v222_v0  }
   0x3   :  { %48 = vperm.xlu0 %361, %v45_v1  }
   0x4   :  { %13 = vsyncpa [#allocation3], 0  ;;  %v401_v3 = vmov 1   ;;  %v162_v4 = vld [vmem:[%s574_s1] sm:$0xff]  ;;  %v402_v6 = vmov 2   ;;  %v403_v7 = vmov 3   ;;  %v30_v9 = vlaneseq }
   0x5   :  { %v276_v5 = vld [vmem:[%s578_s5] sm:$0xff]  ;;  %v404_v8 = vmov 4   ;;  %vm309_vm7 = vcmask 523264   ;;  %vm147_vm14 = vcmask 1041408   ;;  %s337_s28 = sshll.u32 %s581_s8, 4  ;;  %s338_s28 = int_to_ptr.vmem [resolvable:$true] %s337_s28 }
   0x6   :  { %364 = vset.pattern.permute.xlu1 %v401_v3  ;;  %v31_v10 = vand.u32 127, %v30_v9  ;;  %v77_v40 = vld [vmem:[%s575_s2] sm:$0xf]  ;;  %s386_s9 = scalar_lea.vmem %s338_s28, 16  ;;  %p391_p1 = scmp.lt.s32.totalorder %s338_s28, %s338_s28 }
   0x7   :  { %362 = vset.pattern.permute.xlu0 %v401_v3  ;;  %230 = vperm.xlu1 %364, %v222_v0   ;;  %v78_v51 = vmax.f32 %v77_v40, 1e-06  ;;  %v243_v52 = vld [vmem:[%s579_s6] sm:$0x3]  ;;  %p387_p0 = scmp.ne.s32.totalorder %s338_s28, %s386_s9  ;;  %p392_p2 = scmp.lt.s32.totalorder %s386_s9, %s386_s9 }
   0x8   :  { %54 = vperm.xlu0 %362, %v45_v1   ;;  %v32_v11 = vadd.s32 128, %v31_v10  ;;  %v33_v12 = vcvt.s32.f32 %v31_v10  ;;  %v244_v60 = vmax.f32 %v243_v52, 1e-06  ;;  %v294_v40 = vld [vmem:[%s580_s7] sm:$0xff] }
   0x9   :  { %v518_v0 = vmin.f32 %v78_v51, 0.999999  ;;  %p393_p3 = por %p392_p2, %p391_p1 }
   0xa   :  { %v34_v13 = vcvt.s32.f32 %v32_v11  ;;  %v35_v14 = vadd.f32 0.5, %v33_v12  ;;  %v185_v11 = vld [vmem:[%s576_s3 + $0x8] sm:$0xff] }
   0xb   :  { %165 = vperm.xlu1 %364, %v162_v4   ;;  %v80_v10 = vsub.f32 1.0, %v518_v0  ;;  %p394_p4 = pnand %p393_p3, %p387_p0 }
   0xc   :  { %279 = vperm.xlu0 %362, %v276_v5   ;;  %v36_v15 = vadd.f32 0.5, %v34_v13  ;;  %v37_v16 = vmul.f32 0.0625, %v35_v14  ;;  %v218_v18 = vmul.f32 0.125, %v35_v14 }
   0xe   :  { %v38_v17 = vmul.f32 0.0625, %v36_v15  ;;  %v465_v19 = vfloor.f32 %v37_v16  ;;  %v469_v21 = vfloor.f32 %v218_v18 }
   0xf   :  { %365 = vset.pattern.permute.xlu1 %v400_v2 }
  0x10   :  { %366 = vset.pattern.permute.xlu0 %v402_v6  ;;  %171 = vperm.xlu1 %365, %v162_v4   ;;  %v467_v20 = vfloor.f32 %v38_v17  ;;  %v220_v22 = vmul.f32 8.0, %v469_v21  ;;  %v41_v23 = vmul.f32 16.0, %v465_v19 }
  0x11   :  { %177 = vperm.xlu0 %366, %v162_v4  }
  0x12   :  { %v42_v24 = vmul.f32 16.0, %v467_v20  ;;  %v477_v28 = vsub.f32 %v33_v12, %v220_v22  ;;  %v479_v29 = vsub.f32 %v33_v12, %v41_v23 }
  0x14   :  { %284 = vperm.xlu1 %365, %v276_v5   ;;  %v481_v30 = vsub.f32 %v34_v13, %v42_v24  ;;  %v405_v13 = vmov 1983009808  }
  0x15   :  { %368 = vset.pattern.permute.xlu0 %v403_v7  ;;  %v90_v14 = vunpack.c.l.s4 %v405_v13 }
  0x16   :  { %191 = vperm.xlu0 %368, %v162_v4  }
  0x18   :  { %367 = vset.pattern.permute.xlu1 %v402_v6  ;;  %v522_v6 = vmin.f32 %v244_v60, 0.999999 }
  0x19   :  { %289 = vperm.xlu1 %367, %v276_v5  }
  0x1a   :  { %371 = vset.pattern.permute.xlu0 %v404_v8  ;;  %v534_v18 = vsub.f32 1.0, %v522_v6 }
  0x1b   :  { %303 = vperm.xlu0 %371, %v276_v5  }
  0x1d   :  { %369 = vset.pattern.permute.xlu1 %v404_v8  ;;  %v184_v8 = vld [vmem:[%s576_s3] sm:$0xff] }
  0x1e   :  { %197 = vperm.xlu1 %369, %v162_v4  }
  0x22   :  { %370 = vset.pattern.permute.xlu1 %v403_v7 }
  0x23   :  { %298 = vperm.xlu1 %370, %v276_v5  }
  0x81   :  { %v226_v26 = vpop.permute.xlu1 %225 }
  0x82   :  { %v49_v25 = vpop.permute.xlu0 %48  ;;  %v475_v27 = vsub.f32 %v469_v21, %v226_v26 }
  0x83   :  { %v484_v31 = vsub.f32 %v465_v19, %v49_v25  ;;  %v487_v32 = vsub.f32 %v467_v20, %v49_v25 }
  0x84   :  { %v237_v35 = vmul.f32 %v475_v27, %v475_v27 }
  0x85   :  { %v65_v41 = vmul.f32 %v484_v31, %v484_v31  ;;  %v66_v42 = vmul.f32 %v487_v32, %v487_v32  ;;  %vm59_vm11 = vcmp.eq.f32.partialorder %v484_v31, 0.0  ;;  %vm60_vm15 = vcmp.eq.f32.partialorder %v487_v32, 0.0 }
  0x86   :  { %v231_v33 = vpop.permute.xlu1 %230 }
  0x87   :  { %v55_v34 = vpop.permute.xlu0 %54  ;;  %v492_v36 = vsub.f32 %v477_v28, %v231_v33  ;;  %v91_v33 = vunpack.c.0.s8 %v90_v14 }
  0x88   :  { %v495_v37 = vsub.f32 %v479_v29, %v55_v34  ;;  %v498_v38 = vsub.f32 %v481_v30, %v55_v34  ;;  %v93_v34 = vshrl.u32 %v30_v9, 7 }
  0x89   :  { %v238_v39 = vmul.f32 %v492_v36, %v492_v36 }
  0x8a   :  { %v67_v43 = vmul.f32 %v495_v37, %v495_v37  ;;  %v68_v44 = vmul.f32 %v498_v38, %v498_v38  ;;  %v166_v45 = vpop.permute.xlu1 %165  ;;  %v94_v51 = vsub.s32 %v91_v33, %v93_v34  ;;  %vm61_vm10 = vcmp.eq.f32.partialorder %v495_v37, 0.0 }
  0x8b   :  { %v239_v46 = vadd.f32 %v238_v39, %v237_v35  ;;  %v280_v47 = vpop.permute.xlu0 %279  ;;  %v168_v50 = vmul.f32 %v166_v45, %v465_v19  ;;  %v169_v54 = vmul.f32 %v166_v45, %v467_v20  ;;  %vm62_vm12 = vcmp.eq.f32.partialorder %v498_v38, 0.0  ;;  %vm63_vm13 = vmand %vm59_vm11, %vm61_vm10 }
  0x8c   :  { %v69_v48 = vadd.f32 %v67_v43, %v65_v41  ;;  %v70_v49 = vadd.f32 %v68_v44, %v66_v42  ;;  %v282_v12 = vmul.f32 %v280_v47, %v469_v21 }
  0x8d   :  { %v240_v53 = vmul.f32 -0.5, %v239_v46 }
  0x8e   :  { %v71_v55 = vmul.f32 -0.5, %v69_v48  ;;  %v72_v56 = vmul.f32 -0.5, %v70_v49 }
  0x8f   :  { %v241_v57 = vmul.f32 1.442695, %v240_v53  ;;  %v172_v58 = vpop.permute.xlu1 %171 }
  0x90   :  { %v178_v59 = vpop.permute.xlu0 %177  ;;  %v73_v61 = vmul.f32 1.442695, %v71_v55  ;;  %v75_v62 = vmul.f32 1.442695, %v72_v56  ;;  %v174_v63 = vadd.f32 %v172_v58, %v168_v50  ;;  %v175_v1 = vadd.f32 %v172_v58, %v169_v54 }
  0x91   :  { %372 = vpow2.f32 %v241_v57  ;;  %v180_v2 = vmul.f32 %v178_v59, %v479_v29  ;;  %v181_v3 = vmul.f32 %v178_v59, %v481_v30 }
  0x92   :  { %374 = vpow2.f32 %v73_v61 }
  0x93   :  { %376 = vpow2.f32 %v75_v62  ;;  %v285_v4 = vpop.permute.xlu1 %284  ;;  %v182_v5 = vadd.f32 %v180_v2, %v174_v63  ;;  %v183_v7 = vadd.f32 %v181_v3, %v175_v1  ;;  %v101_v1 = vmul.f32 %v518_v0, %v518_v0 }
  0x94   :  { %378 = vlog2.f32 %v518_v0  ;;  %v287_v22 = vadd.f32 %v285_v4, %v282_v12  ;;  %v254_v0 = vmul.f32 %v522_v6, %v522_v6 }
  0x95   :  { %v192_v16 = vpop.permute.xlu0 %191  ;;  %v186_v17 = vsub.f32 %v184_v8, %v182_v5  ;;  %v187_v24 = vsub.f32 %v185_v11, %v183_v7  ;;  %380 = vlog2.f32 %v80_v10 }
  0x96   :  { %382 = vlog2.f32 %v522_v6  ;;  %vm194_vm0 = vcmp.eq.f32.partialorder %v465_v19, %v192_v16  ;;  %vm195_vm1 = vcmp.eq.f32.partialorder %v467_v20, %v192_v16  ;;  %v81_v19 = vmul.f32 %v80_v10, %v80_v10 }
  0x97   :  { %v188_v39 = vand.u32 2147483647, %v186_v17  ;;  %384 = vlog2.f32 %v534_v18  ;;  %v189_v45 = vand.u32 2147483647, %v187_v24 }
  0x98   :  { %v290_v15 = vpop.permute.xlu1 %289 }
  0x99   :  { %v292_v23 = vmul.f32 %v290_v15, %v477_v28 }
  0x9a   :  { %v304_v47 = vpop.permute.xlu0 %303 }
  0x9b   :  { %v373_v25 = vpop.eup %372  ;;  %v293_v26 = vadd.f32 %v292_v23, %v287_v22  ;;  %vm306_vm6 = vcmp.eq.f32.partialorder %v477_v28, %v304_v47 }
  0x9c   :  { %v375_v35 = vpop.eup %374  ;;  %v255_v55 = vsub.f32 1.0, %v373_v25  ;;  %v248_v3 = vmul.f32 %v373_v25, %v373_v25 }
  0x9d   :  { %v377_v41 = vpop.eup %376  ;;  %v82_v42 = vmul.f32 %v375_v35, %v375_v35  ;;  %v102_v43 = vsub.f32 1.0, %v375_v35  ;;  %v198_v44 = vpop.permute.xlu1 %197  ;;  %v295_v49 = vsub.f32 %v294_v40, %v293_v26 }
  0x9e   :  { %v83_v9 = vmul.f32 %v377_v41, %v377_v41  ;;  %v103_v46 = vsub.f32 1.0, %v377_v41  ;;  %vm200_vm2 = vcmp.eq.f32.partialorder %v479_v29, %v198_v44  ;;  %vm201_vm3 = vcmp.eq.f32.partialorder %v481_v30, %v198_v44  ;;  %v379_v53 = vpop.eup %378 }
  0x9f   :  { %vm549_vm4 = vmand %vm194_vm0, %vm200_vm2  ;;  %v84_v50 = vmul.f32 %v82_v42, %v82_v42  ;;  %v104_v52 = vmul.f32 %v102_v43, %v102_v43  ;;  %v381_v61 = vpop.eup %380  ;;  %v296_v62 = vand.u32 2147483647, %v295_v49  ;;  %v99_v63 = vmul.f32 0.6931472, %v379_v53 }
  0xa0   :  { %vm203_vm5 = vmand %vm195_vm1, %vm201_vm3  ;;  %v204_v20 = vsel %vm549_vm4, %v188_v39, 0.0  ;;  %v85_v54 = vmul.f32 %v83_v9, %v83_v9  ;;  %v105_v29 = vmul.f32 %v103_v46, %v103_v46  ;;  %v256_v4 = vmul.f32 %v255_v55, %v255_v55  ;;  %v383_v5 = vpop.eup %382 }
  0xa1   :  { %v205_v30 = vsel %vm203_vm5, %v189_v45, 0.0  ;;  %v106_v56 = vmul.f32 %v104_v52, %v104_v52  ;;  %v385_v8 = vpop.eup %384  ;;  %v121_v13 = vmul.f32 0.6931472, %v381_v61  ;;  %v249_v16 = vmul.f32 %v248_v3, %v248_v3  ;;  %vm64_vm1 = vmand %vm60_vm15, %vm62_vm12 }
  0xa2   :  { %v299_v57 = vpop.permute.xlu1 %298  ;;  %v206_v58 = vadd.f32 %v205_v30, %v204_v20  ;;  %v88_v59 = vcombine.low %v84_v50, %v85_v54  ;;  %v107_v60 = vmul.f32 %v105_v29, %v105_v29  ;;  %v257_v17 = vmul.f32 %v256_v4, %v256_v4 }
  0xa3   :  { %vm301_vm8 = vcmp.eq.f32.partialorder %v469_v21, %v299_v57  ;;  %v247_v21 = vmul.f32 %v534_v18, %v534_v18  ;;  %v252_v24 = vmul.f32 0.6931472, %v383_v5  ;;  %v260_v25 = vmul.f32 0.6931472, %v385_v8 }
  0xa4   :  { %vm307_vm9 = vmand %vm301_vm8, %vm306_vm6  ;;  %207 = vadd.xlane.f32.xlu0 %v206_v58  ;;  %v95_v2 = vrot.slane %v88_v59, %v94_v51  ;;  %v110_v28 = vcombine.low %v106_v56, %v107_v60  ;;  %v258_v33 = vmul.f32 %v257_v17, %v254_v0  ;;  %vm234_vm0 = vcmp.eq.f32.partialorder %v475_v27, 0.0 }
  0xa5   :  { %v308_v7 = vsel %vm307_vm9, %v296_v62, 0.0  ;;  %v250_v18 = vmul.f32 %v249_v16, %v247_v21  ;;  %vm235_vm2 = vcmp.eq.f32.partialorder %v492_v36, 0.0  ;;  %vm263_vm4 = vcmask 517120  }
  0xa6   :  { %v310_v10 = vsel %vm309_vm7, %v308_v7, 0.0  ;;  %v97_v11 = vmul.f32 %v95_v2, %v81_v19  ;;  %v117_v12 = vrot.slane %v110_v28, %v94_v51  ;;  %v261_v39 = vmul.f32 %v260_v25, %v258_v33  ;;  %vm236_vm3 = vmand %vm234_vm0, %vm235_vm2 }
  0xa7   :  { %v253_v37 = vmul.f32 %v252_v24, %v250_v18 }
  0xa8   :  { %311 = vadd.xlane.f32.xlu0 %v310_v10  ;;  %v100_v14 = vmul.f32 %v99_v63, %v97_v11  ;;  %v119_v15 = vmul.f32 %v117_v12, %v101_v1 }
  0xa9   :  { %v262_v42 = vsel %vm236_vm3, %v253_v37, %v261_v39 }
  0xaa   :  { %v122_v22 = vmul.f32 %v121_v13, %v119_v15  ;;  %v130_v23 = vrot.slane %v100_v14, %v94_v51  ;;  %v264_v43 = vsel %vm263_vm4, %v262_v42, 0.0 }
  0xac   :  { %v141_v26 = vrot.slane %v122_v22, %v94_v51  ;;  %v131_v6 = vcombine.high %v130_v23, %v130_v23 }
  0xae   :  { %v142_v34 = vcombine.high %v141_v26, %v141_v26  ;;  %v145_v35 = vsel %vm63_vm13, %v130_v23, %v141_v26 }
  0xaf   :  { %v148_v40 = vsel %vm147_vm14, %v145_v35, 0.0 }
  0xb0   :  { %v146_v31 = vsel %vm64_vm1, %v131_v6, %v142_v34 }
  0xb1   :  { %v149_v38 = vsel %vm147_vm14, %v146_v31, 0.0 }
  0xb2   :  { %v150_v41 = vadd.f32 %v149_v38, %v148_v40 }
  0xb4   :  { %151 = vadd.xlane.f32.xlu1 %v150_v41 }
  0xb8   :  { %265 = vadd.xlane.f32.xlu1 %v264_v43 }
 0x131   :  { %v208_v32 = vpop.xlane.xlu0 %207 }
 0x132   :  { %v209_v44 = vrot.slane %v208_v32, 4 }
 0x134   :  { %v210_v9 = vadd.f32 %v209_v44, %v208_v32 }
 0x135   :  { %v312_v45 = vpop.xlane.xlu0 %311 }
 0x136   :  { %v313_v27 = vrot.slane %v312_v45, 4  ;;  %v211_v46 = vrot.slane %v210_v9, 2 }
 0x138   :  { %v314_v47 = vadd.f32 %v313_v27, %v312_v45  ;;  %v212_v52 = vadd.f32 %v211_v46, %v210_v9 }
 0x13a   :  { %v315_v50 = vrot.slane %v314_v47, 2  ;;  %v213_v30 = vrot.slane %v212_v52, 1 }
 0x13c   :  { %v316_v55 = vadd.f32 %v315_v50, %v314_v47  ;;  %v214_v59 = vadd.f32 %v213_v30, %v212_v52 }
 0x13e   :  { %v317_v60 = vrot.slane %v316_v55, 1 }
 0x140   :  { %v318_v63 = vadd.f32 %v317_v60, %v316_v55 }
 0x141   :  { %v152_v36 = vpop.xlane.xlu1 %151 }
 0x142   :  { %v153_v48 = vrot.slane %v152_v36, 4 }
 0x144   :  { %v154_v49 = vadd.f32 %v153_v48, %v152_v36 }
 0x145   :  { %v266_v51 = vpop.xlane.xlu1 %265 }
 0x146   :  { %v155_v53 = vrot.slane %v154_v49, 2  ;;  %v267_v20 = vrot.slane %v266_v51, 4 }
 0x148   :  { %v268_v54 = vadd.f32 %v267_v20, %v266_v51  ;;  %v156_v29 = vadd.f32 %v155_v53, %v154_v49 }
 0x14a   :  { %v269_v19 = vrot.slane %v268_v54, 2  ;;  %v157_v56 = vrot.slane %v156_v29, 1 }
 0x14c   :  { %v270_v57 = vadd.f32 %v269_v19, %v268_v54  ;;  %v158_v58 = vadd.f32 %v157_v56, %v156_v29 }
 0x14e   :  { %346 = vpush %v158_v58  ;;  %v271_v61 = vrot.slane %v270_v57, 1 }
 0x14f   :  { %348 = vpush %v214_v59 }
 0x150   :  { %v272_v62 = vadd.f32 %v271_v61, %v270_v57 }
 0x152   :  { %350 = vpush %v272_v62 }
 0x153   :  { %352 = vpush %v318_v63 }
 0x17f   :  { %s347_s7 = spop %346 }
 0x180   :  { %s349_s16 = spop %348  ;;  %s160_s17 = smul.f32 -0.00390625, %s347_s7 }
 0x181   :  { %s216_s18 = smul.f32 0.25, %s349_s16 }
 0x183   :  { %s351_s19 = spop %350 }
 0x184   :  { %s274_s20 = smul.f32 -0.015625, %s351_s19  ;;  %s353_s21 = spop %352 }
 0x185   :  { %s320_s22 = smul.f32 0.25, %s353_s21 }
 0x186   :  { %s275_s23 = sadd.f32 %s274_s20, %s160_s17 }
 0x187   :  { %s321_s24 = sadd.f32 %s320_s22, %s216_s18 }
 0x188   :  { %s322_s25 = smul.f32 0.25, %s275_s23 }
 0x189   :  { %s323_s29 = smul.f32 0.25, %s321_s24 }
 0x18a   :  { %328 = sst [smem:[#allocation2 + $0x1]] %s322_s25 }
 0x18b   :  { %s324_s30 = sadd.f32 %s323_s29, %s322_s25 }
 0x18c   :  { %330 = sst [smem:[#allocation2 + $0x2]] %s323_s29 }
 0x18d   :  { %326 = sst [smem:[#allocation2]] %s324_s30 }
 0x18e   :  { %397 = shalt.err (!%p394_p4)
}
 0x18f   :  { %s406_s10 = smov [#allocation2]  }
 0x190   :  { %340 = dma.smem_to_vmem %s406_s10, 16, %s338_s28, [#allocation3]  }
 0x191   :  { %398 = dma.done.wait [#allocation3], 16  }
 0x192   :  { %399 = vsyncadd [#allocation3], 4294967280 }
 0x193   :  { %344 = sfence }
 0x194   :  { %345 = vsyncpa [#allocation3], 1 }

</bundles_post_ra>
